<compile_context>
chip_gen: v6e
topology: v6e:2x2x1
jax: 0.10.0
libtpu: 0.0.40
codegen_flags: <defaults>
</compile_context>

<pallas_src>
import functools

import jax
import jax.numpy as jnp
from jax.experimental import pallas as pl
from jax.experimental.pallas import tpu as pltpu

NUM_INPUT = 30
NUM_HIDDEN = 30
NUM_OUTPUT = 1
PACK_COLS = 3 * NUM_HIDDEN + NUM_OUTPUT   # 91 packed weight/bias columns
DEFAULT_TILE_B = 2048                      # safe in 16 MiB scoped VMEM (v5e)


def _round_up(n, m):
    return ((n + m - 1) // m) * m


def _mlp_kernel(x_ref, w_ref, b_ref, out_ref):
    # x_ref:   (TILE_B, 30)   bf16   activation tile
    # w_ref:   (30, 91)       bf16   [W1 | W2 | W3 | W4] packed along columns
    # b_ref:   (1, 91)        f32    [b1 | b2 | b3 | b4] packed along columns
    # out_ref: (1, 1, TILE_B) f32    lane-dense sigmoid outputs for this tile
    x = x_ref[...]
    w = w_ref[...]
    b = b_ref[...]

    c0, c1, c2, c3 = 0, NUM_HIDDEN, 2 * NUM_HIDDEN, 3 * NUM_HIDDEN

    h = jnp.dot(x, w[:, c0:c1], preferred_element_type=jnp.float32) + b[:, c0:c1]
    h = jnp.maximum(h, 0.0)

    h = jnp.dot(h.astype(jnp.bfloat16), w[:, c1:c2],
                preferred_element_type=jnp.float32) + b[:, c1:c2]
    h = jnp.maximum(h, 0.0)

    h = jnp.dot(h.astype(jnp.bfloat16), w[:, c2:c3],
                preferred_element_type=jnp.float32) + b[:, c2:c3]
    h = jnp.maximum(h, 0.0)

    # Final layer: (TILE_B, 30) @ (30, 1) -> (TILE_B, 1) on the MXU.
    z = jnp.dot(h.astype(jnp.bfloat16), w[:, c3:PACK_COLS],
                preferred_element_type=jnp.float32)

    # Relayout (TILE_B, 1) -> (1, 1, TILE_B) through the (idle) XLU, then do
    # the scalar bias-add + sigmoid on lane-dense vregs and store full-lane.
    z = z.reshape(out_ref.shape)
    out_ref[...] = jax.nn.sigmoid(z + b[0, c3])


@functools.partial(jax.jit, static_argnames=("tile_b",))
def service_model_forward(x, packed_params, *, tile_b=DEFAULT_TILE_B):
    """x: (B, ...) flattening to (B, 30). Returns (B, 1) float32."""
    w_pack, b_pack = packed_params
    B = x.shape[0]
    x2d = x.reshape(B, -1).astype(jnp.float32)             # torch.nn.Flatten()
    assert x2d.shape[1] == NUM_INPUT, f"expected {NUM_INPUT} features, got {x2d.shape[1]}"

    tile_b = max(128, _round_up(tile_b, 128))
    tile = min(tile_b, _round_up(B, 128))                   # lane-aligned batch tile
    b_padded = _round_up(B, tile)
    if b_padded != B:
        x2d = jnp.pad(x2d, ((0, b_padded - B), (0, 0)))
    x_bf16 = x2d.astype(jnp.bfloat16)                       # bf16 HBM stream
    num_tiles = b_padded // tile

    out = pl.pallas_call(
        _mlp_kernel,
        out_shape=jax.ShapeDtypeStruct((num_tiles, 1, tile), jnp.float32),
        grid=(num_tiles,),
        in_specs=[
            pl.BlockSpec((tile, NUM_INPUT), lambda i: (i, 0)),
            pl.BlockSpec((NUM_INPUT, PACK_COLS), lambda i: (0, 0)),  # VMEM-resident
            pl.BlockSpec((1, PACK_COLS), lambda i: (0, 0)),          # VMEM-resident
        ],
        out_specs=pl.BlockSpec((1, 1, tile), lambda i: (i, 0, 0)),
        compiler_params=pltpu.CompilerParams(
            dimension_semantics=("parallel",)),
    )(x_bf16, w_pack, b_pack)

    return out.reshape(b_padded, 1)[:B]


def init_params(key):
    """Mimics torch.nn.Linear default init (U[-1/sqrt(fan_in), +1/sqrt(fan_in)])."""
    def linear(k, fan_in, fan_out):
        kw, kb = jax.random.split(k)
        bound = 1.0 / jnp.sqrt(jnp.float32(fan_in))
        # stored as (in, out) so the kernel computes x @ W
        w = jax.random.uniform(kw, (fan_in, fan_out), jnp.float32, -bound, bound)
        b = jax.random.uniform(kb, (1, fan_out), jnp.float32, -bound, bound)
        return w, b

    k1, k2, k3, k4 = jax.random.split(key, 4)
    w1, b1 = linear(k1, NUM_INPUT, NUM_HIDDEN)
    w2, b2 = linear(k2, NUM_HIDDEN, NUM_HIDDEN)
    w3, b3 = linear(k3, NUM_HIDDEN, NUM_HIDDEN)
    w4, b4 = linear(k4, NUM_HIDDEN, NUM_OUTPUT)
    return (w1, b1, w2, b2, w3, b3, w4, b4)


def pack_params(params):
    """Consolidate the 8 small tensors into one bf16 weight slab + one f32 bias slab."""
    w1, b1, w2, b2, w3, b3, w4, b4 = params
    w_pack = jnp.concatenate([w1, w2, w3, w4], axis=1).astype(jnp.bfloat16)  # (30, 91)
    b_pack = jnp.concatenate([b1, b2, b3, b4], axis=1).astype(jnp.float32)   # (1, 91)
    return w_pack, b_pack


def _reference_forward(x, params):
    """Pure-JAX f32 reference."""
    B = x.shape[0]
    h = x.reshape(B, -1).astype(jnp.float32)
    w1, b1, w2, b2, w3, b3, w4, b4 = params
    h = jnp.maximum(h @ w1 + b1, 0.0)
    h = jnp.maximum(h @ w2 + b2, 0.0)
    h = jnp.maximum(h @ w3 + b3, 0.0)
    return jax.nn.sigmoid(h @ w4 + b4)


if __name__ == "__main__":
    key = jax.random.PRNGKey(0)
    k_params, k_x1, k_x2 = jax.random.split(key, 3)

    params = init_params(k_params)
    packed = pack_params(params)

    # Primary small run (single tile).
    batch = 8
    x = jax.random.normal(k_x1, (batch, NUM_INPUT), jnp.float32)
    y = jax.block_until_ready(service_model_forward(x, packed))
    y_ref = _reference_forward(x, params)
    assert y.shape == (batch, NUM_OUTPUT)
    # bf16 matmul inputs -> looser tolerance vs. the f32 reference.
    assert jnp.allclose(y, y_ref, atol=2e-2, rtol=2e-2), "mismatch vs reference (small)"

    # Multi-tile + ragged-batch check (exercises grid > 1 and the padding path).
    x2 = jax.random.normal(k_x2, (300, NUM_INPUT), jnp.float32)
    y2 = jax.block_until_ready(service_model_forward(x2, packed, tile_b=128))
    y2_ref = _reference_forward(x2, params)
    assert y2.shape == (300, NUM_OUTPUT)
    assert jnp.allclose(y2, y2_ref, atol=2e-2, rtol=2e-2), "mismatch vs reference (multi-tile)"

    print("KERNEL_OK")
</pallas_src>

<mosaic_0001>
module attributes {stable_mosaic.version = 11 : i64} {
  func.func @_mlp_kernel(%arg0: i32, %arg1: memref<128x30xbf16, #tpu.memory_space<vmem>>, %arg2: memref<30x91xbf16, #tpu.memory_space<vmem>>, %arg3: memref<1x91xf32, #tpu.memory_space<vmem>>, %arg4: memref<1x1x128xf32, #tpu.memory_space<vmem>>) attributes {dimension_semantics = [#tpu.dimension_semantics<parallel>], iteration_bounds = array<i64: 1>, scalar_prefetch = 0 : i64, scratch_operands = 0 : i64, tpu.core_type = #tpu.core_type<tc>, window_params = [{transform_indices = @transform_0, window_bounds = array<i64: 128, 30>}, {pipeline_mode = #tpu.pipeline_mode<synchronous>, transform_indices = @transform_1, window_bounds = array<i64: 30, 91>}, {pipeline_mode = #tpu.pipeline_mode<synchronous>, transform_indices = @transform_2, window_bounds = array<i64: 1, 91>}, {transform_indices = @transform_3, window_bounds = array<i64: 1, 1, 128>}]} {
    %c0 = arith.constant 0 : index
    %c0_0 = arith.constant 0 : index
    %0 = vector.load %arg1[%c0, %c0_0] : memref<128x30xbf16, #tpu.memory_space<vmem>>, vector<128x30xbf16>
    %c0_1 = arith.constant 0 : index
    %c0_2 = arith.constant 0 : index
    %1 = vector.load %arg2[%c0_1, %c0_2] : memref<30x91xbf16, #tpu.memory_space<vmem>>, vector<30x91xbf16>
    %c0_3 = arith.constant 0 : index
    %c0_4 = arith.constant 0 : index
    %2 = vector.load %arg3[%c0_3, %c0_4] : memref<1x91xf32, #tpu.memory_space<vmem>>, vector<1x91xf32>
    %3 = vector.extract_strided_slice %1 {offsets = [0, 0], sizes = [30, 30], strides = [1, 1]} : vector<30x91xbf16> to vector<30x30xbf16>
    %cst = arith.constant dense<0.000000e+00> : vector<128x30xf32>
    %4 = tpu.matmul %0, %3, %cst {dimension_numbers = #tpu.dot_dimension_numbers<[1], [0], [0], [1], [0, 0, 1, 1], [], []>} : vector<128x30xbf16>, vector<30x30xbf16>, vector<128x30xf32> -> vector<128x30xf32>
    %5 = vector.extract_strided_slice %2 {offsets = [0, 0], sizes = [1, 30], strides = [1, 1]} : vector<1x91xf32> to vector<1x30xf32>
    %6 = vector.broadcast %5 : vector<1x30xf32> to vector<128x30xf32>
    %7 = arith.addf %4, %6 : vector<128x30xf32>
    %cst_5 = arith.constant 0.000000e+00 : f32
    %8 = vector.broadcast %cst_5 : f32 to vector<128x30xf32>
    %9 = arith.maximumf %7, %8 : vector<128x30xf32>
    %10 = arith.truncf %9 : vector<128x30xf32> to vector<128x30xbf16>
    %11 = vector.extract_strided_slice %1 {offsets = [0, 30], sizes = [30, 30], strides = [1, 1]} : vector<30x91xbf16> to vector<30x30xbf16>
    %cst_6 = arith.constant dense<0.000000e+00> : vector<128x30xf32>
    %12 = tpu.matmul %10, %11, %cst_6 {dimension_numbers = #tpu.dot_dimension_numbers<[1], [0], [0], [1], [0, 0, 1, 1], [], []>} : vector<128x30xbf16>, vector<30x30xbf16>, vector<128x30xf32> -> vector<128x30xf32>
    %13 = vector.extract_strided_slice %2 {offsets = [0, 30], sizes = [1, 30], strides = [1, 1]} : vector<1x91xf32> to vector<1x30xf32>
    %14 = vector.broadcast %13 : vector<1x30xf32> to vector<128x30xf32>
    %15 = arith.addf %12, %14 : vector<128x30xf32>
    %cst_7 = arith.constant 0.000000e+00 : f32
    %16 = vector.broadcast %cst_7 : f32 to vector<128x30xf32>
    %17 = arith.maximumf %15, %16 : vector<128x30xf32>
    %18 = arith.truncf %17 : vector<128x30xf32> to vector<128x30xbf16>
    %19 = vector.extract_strided_slice %1 {offsets = [0, 60], sizes = [30, 30], strides = [1, 1]} : vector<30x91xbf16> to vector<30x30xbf16>
    %cst_8 = arith.constant dense<0.000000e+00> : vector<128x30xf32>
    %20 = tpu.matmul %18, %19, %cst_8 {dimension_numbers = #tpu.dot_dimension_numbers<[1], [0], [0], [1], [0, 0, 1, 1], [], []>} : vector<128x30xbf16>, vector<30x30xbf16>, vector<128x30xf32> -> vector<128x30xf32>
    %21 = vector.extract_strided_slice %2 {offsets = [0, 60], sizes = [1, 30], strides = [1, 1]} : vector<1x91xf32> to vector<1x30xf32>
    %22 = vector.broadcast %21 : vector<1x30xf32> to vector<128x30xf32>
    %23 = arith.addf %20, %22 : vector<128x30xf32>
    %cst_9 = arith.constant 0.000000e+00 : f32
    %24 = vector.broadcast %cst_9 : f32 to vector<128x30xf32>
    %25 = arith.maximumf %23, %24 : vector<128x30xf32>
    %26 = arith.truncf %25 : vector<128x30xf32> to vector<128x30xbf16>
    %27 = vector.extract_strided_slice %1 {offsets = [0, 90], sizes = [30, 1], strides = [1, 1]} : vector<30x91xbf16> to vector<30x1xbf16>
    %cst_10 = arith.constant dense<0.000000e+00> : vector<128x1xf32>
    %28 = tpu.matmul %26, %27, %cst_10 {dimension_numbers = #tpu.dot_dimension_numbers<[1], [0], [0], [1], [0, 0, 1, 1], [], []>} : vector<128x30xbf16>, vector<30x1xbf16>, vector<128x1xf32> -> vector<128x1xf32>
    %29 = vector.shape_cast %28 : vector<128x1xf32> to vector<1x1x128xf32>
    %30 = vector.extract_strided_slice %2 {offsets = [0, 90], sizes = [1, 1], strides = [1, 1]} : vector<1x91xf32> to vector<1x1xf32>
    %31 = vector.extract %30[0, 0] : f32 from vector<1x1xf32>
    %32 = vector.broadcast %31 : f32 to vector<1x1x128xf32>
    %33 = arith.addf %29, %32 : vector<1x1x128xf32>
    %34 = arith.negf %33 : vector<1x1x128xf32>
    %35 = math.exp %34 : vector<1x1x128xf32>
    %cst_11 = arith.constant 1.000000e+00 : f32
    %36 = vector.broadcast %cst_11 : f32 to vector<1x1x128xf32>
    %37 = arith.addf %36, %35 : vector<1x1x128xf32>
    %38 = arith.divf %36, %37 : vector<1x1x128xf32>
    %c0_12 = arith.constant 0 : index
    %c0_13 = arith.constant 0 : index
    %c0_14 = arith.constant 0 : index
    %39 = vector.load %arg4[%c0_12, %c0_13, %c0_14] : memref<1x1x128xf32, #tpu.memory_space<vmem>>, vector<1x1x128xf32>
    tpu.vector_store %arg4[%c0_12, %c0_13, %c0_14], %38 {strides = array<i32>} : memref<1x1x128xf32, #tpu.memory_space<vmem>>, vector<1x1x128xf32>,
    return
  }
  func.func @transform_0(%arg0: i32) -> (i32, i32) {
    %c0_i32 = arith.constant 0 : i32
    %c0_i32_0 = arith.constant 0 : i32
    return %arg0, %c0_i32 : i32, i32
  }
  func.func @transform_1(%arg0: i32) -> (i32, i32) {
    %c0_i32 = arith.constant 0 : i32
    %c0_i32_0 = arith.constant 0 : i32
    %c0_i32_1 = arith.constant 0 : i32
    return %c0_i32, %c0_i32_0 : i32, i32
  }
  func.func @transform_2(%arg0: i32) -> (i32, i32) {
    %c0_i32 = arith.constant 0 : i32
    %c0_i32_0 = arith.constant 0 : i32
    %c0_i32_1 = arith.constant 0 : i32
    return %c0_i32, %c0_i32_0 : i32, i32
  }
  func.func @transform_3(%arg0: i32) -> (i32, i32, i32) {
    %c0_i32 = arith.constant 0 : i32
    %c0_i32_0 = arith.constant 0 : i32
    %c0_i32_1 = arith.constant 0 : i32
    return %arg0, %c0_i32, %c0_i32_0 : i32, i32, i32
  }
}

</mosaic_0001>

<bundles_post_ra>
// kernel: service_model_forward.1
= control target key start
LH: loop header
LB: loop body
LE: loop exit
PB: predicated region body
PF: predicated region fallthrough
CT: control target
= control target key end

     0   :  { %vm118_vm0 = vcmask 1046528   ;;  %vm93_vm1 = vcmask 244736   ;;  %s1245_s18 = smov 98   ;;  %v37_v11 = vlaneseq  ;;  %s1246_s7 = smov 68   ;;  %vm875_vm2 = vcmask 130112   ;;  %s1443_s1 = inlined_call_operand.vmem [shape: bf16[30,91], index: 1, kind: input, shape index: {}]   ;;  %s1444_s0 = inlined_call_operand.vmem [shape: bf16[128,30], index: 0, kind: input, shape index: {}]   ;;  %s1445_s2 = inlined_call_operand.vmem [shape: f32[1,91], index: 2, kind: input, shape index: {}]   ;;  %s1446_s3 = inlined_call_operand.vmem [shape: f32[1,1,128], index: 3, kind: output, shape index: {}]  }
   0x1   :  { %v1272_v0 = vld [vmem:[%s1443_s1 + $0x8] sm:$0x7f]   ;;  %v1277_v1 = vld [vmem:[%s1443_s1] sm:$0xff]   ;;  %v1175_v5 = vld [vmem:[%s1444_s0 + $0x10] sm:$0xff]   ;;  %vm882_vm3 = vcmask 195712   ;;  %vm889_vm4 = vcmask 261312  }
   0x2   :  { %1159 = vmatprep.subr.msk.bf16.mxu0 %vm118_vm0, %v1272_v0  ;;  %v120_v2 = vsel %vm118_vm0, %v1272_v0, 0  ;;  %v1173_v3 = vld [vmem:[%s1444_s0] sm:$0xff]   ;;  %245 = vrot.lane.b32.xlu0 %v1272_v0, %s1245_s18  ;;  %v1174_v4 = vld [vmem:[%s1444_s0 + $0x8] sm:$0xff]   ;;  %v1176_v6 = vld [vmem:[%s1444_s0 + $0x18] sm:$0xff]   ;;  %v1322_v12 = vshrl.u32 %v37_v11, 7  ;;  %vm896_vm5 = vcmask 326912  }
   0x3   :  { %1080 = vmatpush3.bf16.msra.mxu0 %v120_v2  ;;  %1083 = vmatprep.mubr.msk.bf16.mxu0 %vm93_vm1, %v1173_v3  ;;  %v1177_v7 = vld [vmem:[%s1444_s0 + $0x20] sm:$0xff]   ;;  %v1178_v8 = vld [vmem:[%s1444_s0 + $0x28] sm:$0xff]   ;;  %v1179_v9 = vld [vmem:[%s1444_s0 + $0x30] sm:$0xff]   ;;  %vm903_vm6 = vcmask 392512   ;;  %vm910_vm7 = vcmask 458112   ;;  %vm917_vm8 = vcmask 523712  }
   0x4   :  { %1081 = vmatprep.subr.bf16.mxu0 %v1277_v1  ;;  %v1180_v10 = vld [vmem:[%s1444_s0 + $0x38] sm:$0xff]   ;;  %v39_v13 = vsub.s32 0, %v1322_v12  ;;  %v1328_v14 = vld [vmem:[%s1445_s2] sm:$0x1]  ;;  %401 = vrot.lane.b32.xlu1 %v1272_v0, %s1246_s7  ;;  %s1247_s0 = smov 38   ;;  %vm924_vm9 = vcmask 589312  }
   0x5   :  { %vm931_vm10 = vcmask 654912   ;;  %vm938_vm11 = vcmask 720512   ;;  %vm945_vm12 = vcmask 786112   ;;  %vm952_vm13 = vcmask 851712  }
   0x6   :  { %243 = vrot.lane.b32.xlu0 %v1277_v1, %s1245_s18  ;;  %v1333_v15 = vrot.slane %v1328_v14, %v39_v13  ;;  %vm959_vm14 = vcmask 917312   ;;  %vm966_vm15 = vcmask 982912  }
   0x7   :  { %1082 = vmatpush3.bf16.msra.mxu0 %v1277_v1 }
   0x8   :  { %248 = vrot.lane.b32.xlu1 %v1333_v15, %s1245_s18 }
   0xa   :  { %1084 = vmatmul.mubr.msk.bf16.vlgmr.msra.gmra.mxu0 %vm93_vm1, %v1174_v4  ;;  %399 = vrot.lane.b32.xlu0 %v1277_v1, %s1246_s7 }
   0xb   :  { %1087 = vmatprep.mubr.msk.bf16.mxu0 %vm93_vm1, %v1175_v5 }
   0xc   :  { %557 = vrot.lane.b32.xlu1 %v1272_v0, %s1247_s0 }
   0xe   :  { %404 = vrot.lane.b32.xlu0 %v1333_v15, %s1246_s7 }
  0x10   :  { %555 = vrot.lane.b32.xlu1 %v1277_v1, %s1247_s0 }
  0x12   :  { %1088 = vmatmul.mubr.msk.bf16.gmra.mxu0 %vm93_vm1, %v1176_v6  ;;  %684 = vrot.lane.b32.xlu0 %v1328_v14, %s1247_s0 }
  0x13   :  { %1091 = vmatprep.mubr.msk.bf16.mxu0 %vm93_vm1, %v1177_v7 }
  0x1a   :  { %1092 = vmatmul.mubr.msk.bf16.gmra.mxu0 %vm93_vm1, %v1178_v8 }
  0x1b   :  { %1095 = vmatprep.mubr.msk.bf16.mxu0 %vm93_vm1, %v1179_v9 }
  0x22   :  { %1096 = vmatmul.mubr.msk.bf16.gmra.mxu0 %vm93_vm1, %v1180_v10 }
  0x74   :  { %v246_v16 = vpop.permute.xlu0 %245 }
  0x75   :  { %1160 = vmatprep.subr.msk.bf16.mxu1 %vm118_vm0, %v246_v16  ;;  %v276_v17 = vsel %vm118_vm0, %v246_v16, 0 }
  0x76   :  { %1100 = vmatpush3.bf16.msra.mxu1 %v276_v17  ;;  %v402_v59 = vpop.permute.xlu1 %401 }
  0x77   :  { %v432_v63 = vsel %vm118_vm0, %v402_v59, 0  ;;  %1161 = vmatprep.subr.msk.bf16.mxu0 %vm118_vm0, %v402_v59 }
  0x78   :  { %v244_v18 = vpop.permute.xlu0 %243  ;;  %1120 = vmatpush3.bf16.msra.mxu0 %v432_v63 }
  0x79   :  { %1101 = vmatprep.subr.bf16.mxu1 %v244_v18 }
  0x7a   :  { %1102 = vmatpush3.bf16.msra.mxu1 %v244_v18 }
  0x7c   :  { %v400_v60 = vpop.permute.xlu0 %399 }
  0x7d   :  { %1121 = vmatprep.subr.bf16.mxu0 %v400_v60 }
  0x7e   :  { %1122 = vmatpush3.bf16.msra.mxu0 %v400_v60 }
  0xca   :  { %v1085_v19 = vpop.f32.mrf.mxu0 }
  0xcb   :  { %v165_v24 = vadd.f32 %v1085_v19, %v1333_v15 }
  0xcc   :  { %v156_v20 = vpop.f32.mrf.mxu0 }
  0xcd   :  { %v157_v22 = vadd.f32 %v156_v20, %v1333_v15  ;;  %v221_v31 = vmax.f32 %v165_v24, 0.0 }
  0xce   :  { %v1086_v21 = vpop.f32.mrf.mxu0 }
  0xcf   :  { %v168_v23 = vadd.f32 %v1086_v21, %v1333_v15  ;;  %v219_v29 = vmax.f32 %v157_v22, 0.0  ;;  %v249_v21 = vpop.permute.xlu1 %248 }
  0xd0   :  { %v159_v25 = vpop.f32.mrf.mxu0 }
  0xd1   :  { %v160_v26 = vadd.f32 %v159_v25, %v1333_v15  ;;  %v222_v27 = vmax.f32 %v168_v23, 0.0 }
  0xd2   :  { %v1089_v28 = vpop.f32.mrf.mxu0 }
  0xd3   :  { %v220_v30 = vmax.f32 %v160_v26, 0.0  ;;  %v236_v34 = vpack.c.bf16 %v222_v27, %v221_v31  ;;  %v181_v38 = vadd.f32 %v1089_v28, %v1333_v15 }
  0xd4   :  { %v172_v32 = vpop.f32.mrf.mxu0 }
  0xd5   :  { %v235_v33 = vpack.c.bf16 %v220_v30, %v219_v29  ;;  %v173_v36 = vadd.f32 %v172_v32, %v1333_v15  ;;  %v225_v45 = vmax.f32 %v181_v38, 0.0 }
  0xd6   :  { %v1090_v35 = vpop.f32.mrf.mxu0 }
  0xd7   :  { %v184_v37 = vadd.f32 %v1090_v35, %v1333_v15  ;;  %1103 = vmatprep.mubr.msk.bf16.mxu1 %vm93_vm1, %v235_v33  ;;  %v223_v43 = vmax.f32 %v173_v36, 0.0 }
  0xd8   :  { %v175_v39 = vpop.f32.mrf.mxu0  ;;  %1104 = vmatmul.mubr.msk.bf16.vlgmr.msra.gmra.mxu1 %vm93_vm1, %v236_v34 }
  0xd9   :  { %v176_v40 = vadd.f32 %v175_v39, %v1333_v15  ;;  %v226_v41 = vmax.f32 %v184_v37, 0.0 }
  0xda   :  { %v1093_v42 = vpop.f32.mrf.mxu0 }
  0xdb   :  { %v224_v44 = vmax.f32 %v176_v40, 0.0  ;;  %v238_v48 = vpack.c.bf16 %v226_v41, %v225_v45  ;;  %v197_v52 = vadd.f32 %v1093_v42, %v1333_v15 }
  0xdc   :  { %v188_v46 = vpop.f32.mrf.mxu0 }
  0xdd   :  { %v237_v47 = vpack.c.bf16 %v224_v44, %v223_v43  ;;  %v189_v50 = vadd.f32 %v188_v46, %v1333_v15  ;;  %v229_v61 = vmax.f32 %v197_v52, 0.0 }
  0xde   :  { %v1094_v49 = vpop.f32.mrf.mxu0 }
  0xdf   :  { %v200_v51 = vadd.f32 %v1094_v49, %v1333_v15  ;;  %1107 = vmatprep.mubr.msk.bf16.mxu1 %vm93_vm1, %v237_v47  ;;  %v227_v57 = vmax.f32 %v189_v50, 0.0 }
  0xe0   :  { %v191_v53 = vpop.f32.mrf.mxu0  ;;  %1108 = vmatmul.mubr.msk.bf16.gmra.mxu1 %vm93_vm1, %v238_v48 }
  0xe1   :  { %v192_v54 = vadd.f32 %v191_v53, %v1333_v15  ;;  %v230_v55 = vmax.f32 %v200_v51, 0.0 }
  0xe2   :  { %v1097_v56 = vpop.f32.mrf.mxu0 }
  0xe3   :  { %v228_v58 = vmax.f32 %v192_v54, 0.0  ;;  %v240_v3 = vpack.c.bf16 %v230_v55, %v229_v61  ;;  %v213_v7 = vadd.f32 %v1097_v56, %v1333_v15 }
  0xe4   :  { %v204_v62 = vpop.f32.mrf.mxu0 }
  0xe5   :  { %v239_v2 = vpack.c.bf16 %v228_v58, %v227_v57  ;;  %v205_v5 = vadd.f32 %v204_v62, %v1333_v15  ;;  %v233_v17 = vmax.f32 %v213_v7, 0.0  ;;  %v558_v57 = vpop.permute.xlu1 %557 }
  0xe6   :  { %v1098_v4 = vpop.f32.mrf.mxu0  ;;  %v585_v60 = vsel %vm118_vm0, %v558_v57, 0  ;;  %1162 = vmatprep.subr.msk.bf16.mxu1 %vm118_vm0, %v558_v57  ;;  %vm973_vm0 = vcmask 1048512  }
  0xe7   :  { %v216_v6 = vadd.f32 %v1098_v4, %v1333_v15  ;;  %1111 = vmatprep.mubr.msk.bf16.mxu1 %vm93_vm1, %v239_v2  ;;  %v231_v13 = vmax.f32 %v205_v5, 0.0  ;;  %1140 = vmatpush3.bf16.msra.mxu1 %v585_v60 }
  0xe8   :  { %v207_v8 = vpop.f32.mrf.mxu0  ;;  %1112 = vmatmul.mubr.msk.bf16.gmra.mxu1 %vm93_vm1, %v240_v3 }
  0xe9   :  { %v208_v9 = vadd.f32 %v207_v8, %v1333_v15  ;;  %v234_v10 = vmax.f32 %v216_v6, 0.0  ;;  %v556_v4 = vpop.permute.xlu1 %555 }
  0xea   :  { %1141 = vmatprep.subr.bf16.mxu1 %v556_v4 }
  0xeb   :  { %v232_v16 = vmax.f32 %v208_v9, 0.0  ;;  %v242_v19 = vpack.c.bf16 %v234_v10, %v233_v17  ;;  %1142 = vmatpush3.bf16.msra.mxu1 %v556_v4 }
  0xed   :  { %v241_v18 = vpack.c.bf16 %v232_v16, %v231_v13 }
  0xef   :  { %1115 = vmatprep.mubr.msk.bf16.mxu1 %vm93_vm1, %v241_v18  ;;  %v405_v18 = vpop.permute.xlu0 %404 }
  0xf0   :  { %1116 = vmatmul.mubr.msk.bf16.gmra.mxu1 %vm93_vm1, %v242_v19 }
  0xf3   :  { %v685_v19 = vpop.permute.xlu0 %684 }
  0xf4   :  { %1163 = vpush %v685_v19 }
 0x125   :  { %s1164_s2 = spop %1163 }
 0x198   :  { %v1105_v20 = vpop.f32.mrf.mxu1 }
 0x199   :  { %v321_v25 = vadd.f32 %v1105_v20, %v249_v21 }
 0x19a   :  { %v312_v15 = vpop.f32.mrf.mxu1 }
 0x19b   :  { %v313_v23 = vadd.f32 %v312_v15, %v249_v21  ;;  %v377_v32 = vmax.f32 %v321_v25, 0.0 }
 0x19c   :  { %v1106_v22 = vpop.f32.mrf.mxu1 }
 0x19d   :  { %v324_v24 = vadd.f32 %v1106_v22, %v249_v21  ;;  %v375_v30 = vmax.f32 %v313_v23, 0.0 }
 0x19e   :  { %v315_v26 = vpop.f32.mrf.mxu1 }
 0x19f   :  { %v316_v27 = vadd.f32 %v315_v26, %v249_v21  ;;  %v378_v28 = vmax.f32 %v324_v24, 0.0 }
 0x1a0   :  { %v1109_v29 = vpop.f32.mrf.mxu1 }
 0x1a1   :  { %v376_v31 = vmax.f32 %v316_v27, 0.0  ;;  %v392_v34 = vpack.c.bf16 %v378_v28, %v377_v32  ;;  %v337_v36 = vadd.f32 %v1109_v29, %v249_v21 }
 0x1a2   :  { %v328_v33 = vpop.f32.mrf.mxu1 }
 0x1a3   :  { %v391_v0 = vpack.c.bf16 %v376_v31, %v375_v30  ;;  %v329_v35 = vadd.f32 %v328_v33, %v249_v21  ;;  %v381_v43 = vmax.f32 %v337_v36, 0.0 }
 0x1a4   :  { %v1110_v14 = vpop.f32.mrf.mxu1 }
 0x1a5   :  { %v340_v1 = vadd.f32 %v1110_v14, %v249_v21  ;;  %1123 = vmatprep.mubr.msk.bf16.mxu0 %vm93_vm1, %v391_v0  ;;  %v379_v41 = vmax.f32 %v329_v35, 0.0 }
 0x1a6   :  { %v331_v37 = vpop.f32.mrf.mxu1  ;;  %1124 = vmatmul.mubr.msk.bf16.vlgmr.msra.gmra.mxu0 %vm93_vm1, %v392_v34 }
 0x1a7   :  { %v332_v38 = vadd.f32 %v331_v37, %v249_v21  ;;  %v382_v39 = vmax.f32 %v340_v1, 0.0 }
 0x1a8   :  { %v1113_v40 = vpop.f32.mrf.mxu1 }
 0x1a9   :  { %v380_v42 = vmax.f32 %v332_v38, 0.0  ;;  %v394_v46 = vpack.c.bf16 %v382_v39, %v381_v43  ;;  %v353_v50 = vadd.f32 %v1113_v40, %v249_v21 }
 0x1aa   :  { %v344_v44 = vpop.f32.mrf.mxu1 }
 0x1ab   :  { %v393_v45 = vpack.c.bf16 %v380_v42, %v379_v41  ;;  %v345_v48 = vadd.f32 %v344_v44, %v249_v21  ;;  %v385_v58 = vmax.f32 %v353_v50, 0.0 }
 0x1ac   :  { %v1114_v47 = vpop.f32.mrf.mxu1 }
 0x1ad   :  { %v356_v49 = vadd.f32 %v1114_v47, %v249_v21  ;;  %1127 = vmatprep.mubr.msk.bf16.mxu0 %vm93_vm1, %v393_v45  ;;  %v383_v55 = vmax.f32 %v345_v48, 0.0 }
 0x1ae   :  { %v347_v51 = vpop.f32.mrf.mxu1  ;;  %1128 = vmatmul.mubr.msk.bf16.gmra.mxu0 %vm93_vm1, %v394_v46 }
 0x1af   :  { %v348_v52 = vadd.f32 %v347_v51, %v249_v21  ;;  %v386_v53 = vmax.f32 %v356_v49, 0.0 }
 0x1b0   :  { %v1117_v54 = vpop.f32.mrf.mxu1 }
 0x1b1   :  { %v384_v56 = vmax.f32 %v348_v52, 0.0  ;;  %v396_v62 = vpack.c.bf16 %v386_v53, %v385_v58  ;;  %v369_v5 = vadd.f32 %v1117_v54, %v249_v21 }
 0x1b2   :  { %v360_v59 = vpop.f32.mrf.mxu1 }
 0x1b3   :  { %v395_v61 = vpack.c.bf16 %v384_v56, %v383_v55  ;;  %v361_v2 = vadd.f32 %v360_v59, %v249_v21  ;;  %v389_v13 = vmax.f32 %v369_v5, 0.0 }
 0x1b4   :  { %v1118_v63 = vpop.f32.mrf.mxu1 }
 0x1b5   :  { %v372_v3 = vadd.f32 %v1118_v63, %v249_v21  ;;  %1131 = vmatprep.mubr.msk.bf16.mxu0 %vm93_vm1, %v395_v61  ;;  %v387_v9 = vmax.f32 %v361_v2, 0.0 }
 0x1b6   :  { %v363_v6 = vpop.f32.mrf.mxu1  ;;  %1132 = vmatmul.mubr.msk.bf16.gmra.mxu0 %vm93_vm1, %v396_v62 }
 0x1b7   :  { %v364_v7 = vadd.f32 %v363_v6, %v249_v21  ;;  %v390_v8 = vmax.f32 %v372_v3, 0.0 }
 0x1b9   :  { %v388_v10 = vmax.f32 %v364_v7, 0.0  ;;  %v398_v17 = vpack.c.bf16 %v390_v8, %v389_v13  ;;  %v1387_v13 = vstv %s1164_s2 }
 0x1bb   :  { %v397_v16 = vpack.c.bf16 %v388_v10, %v387_v9  ;;  %v1248_v10 = vmov 0  }
 0x1bc   :  { %1169 = vset.pattern.permute.xlu1 %v1248_v10  ;;  %1170 = vset.pattern.permute.xlu0 %v1248_v10 }
 0x1bd   :  { %1135 = vmatprep.mubr.msk.bf16.mxu0 %vm93_vm1, %v397_v16 }
 0x1be   :  { %1136 = vmatmul.mubr.msk.bf16.gmra.mxu0 %vm93_vm1, %v398_v17 }
 0x266   :  { %v1125_v20 = vpop.f32.mrf.mxu0 }
 0x267   :  { %v477_v21 = vadd.f32 %v1125_v20, %v405_v18 }
 0x268   :  { %v468_v15 = vpop.f32.mrf.mxu0 }
 0x269   :  { %v469_v23 = vadd.f32 %v468_v15, %v405_v18  ;;  %v533_v31 = vmax.f32 %v477_v21, 0.0 }
 0x26a   :  { %v1126_v22 = vpop.f32.mrf.mxu0 }
 0x26b   :  { %v480_v24 = vadd.f32 %v1126_v22, %v405_v18  ;;  %v531_v29 = vmax.f32 %v469_v23, 0.0 }
 0x26c   :  { %v471_v25 = vpop.f32.mrf.mxu0 }
 0x26d   :  { %v472_v26 = vadd.f32 %v471_v25, %v405_v18  ;;  %v534_v27 = vmax.f32 %v480_v24, 0.0 }
 0x26e   :  { %v1129_v28 = vpop.f32.mrf.mxu0 }
 0x26f   :  { %v532_v30 = vmax.f32 %v472_v26, 0.0  ;;  %v548_v0 = vpack.c.bf16 %v534_v27, %v533_v31  ;;  %v493_v1 = vadd.f32 %v1129_v28, %v405_v18 }
 0x270   :  { %v484_v32 = vpop.f32.mrf.mxu0 }
 0x271   :  { %v547_v33 = vpack.c.bf16 %v532_v30, %v531_v29  ;;  %v485_v14 = vadd.f32 %v484_v32, %v405_v18  ;;  %v537_v42 = vmax.f32 %v493_v1, 0.0 }
 0x272   :  { %v1130_v34 = vpop.f32.mrf.mxu0 }
 0x273   :  { %v496_v35 = vadd.f32 %v1130_v34, %v405_v18  ;;  %1143 = vmatprep.mubr.msk.bf16.mxu1 %vm93_vm1, %v547_v33  ;;  %v535_v40 = vmax.f32 %v485_v14, 0.0 }
 0x274   :  { %v487_v36 = vpop.f32.mrf.mxu0  ;;  %1144 = vmatmul.mubr.msk.bf16.vlgmr.msra.gmra.mxu1 %vm93_vm1, %v548_v0 }
 0x275   :  { %v488_v37 = vadd.f32 %v487_v36, %v405_v18  ;;  %v538_v38 = vmax.f32 %v496_v35, 0.0 }
 0x276   :  { %v1133_v39 = vpop.f32.mrf.mxu0 }
 0x277   :  { %v536_v41 = vmax.f32 %v488_v37, 0.0  ;;  %v550_v45 = vpack.c.bf16 %v538_v38, %v537_v42  ;;  %v509_v49 = vadd.f32 %v1133_v39, %v405_v18 }
 0x278   :  { %v500_v43 = vpop.f32.mrf.mxu0 }
 0x279   :  { %v549_v44 = vpack.c.bf16 %v536_v41, %v535_v40  ;;  %v501_v47 = vadd.f32 %v500_v43, %v405_v18  ;;  %v541_v56 = vmax.f32 %v509_v49, 0.0 }
 0x27a   :  { %v1134_v46 = vpop.f32.mrf.mxu0 }
 0x27b   :  { %v512_v48 = vadd.f32 %v1134_v46, %v405_v18  ;;  %1147 = vmatprep.mubr.msk.bf16.mxu1 %vm93_vm1, %v549_v44  ;;  %v539_v54 = vmax.f32 %v501_v47, 0.0 }
 0x27c   :  { %v503_v50 = vpop.f32.mrf.mxu0  ;;  %1148 = vmatmul.mubr.msk.bf16.gmra.mxu1 %vm93_vm1, %v550_v45 }
 0x27d   :  { %v504_v51 = vadd.f32 %v503_v50, %v405_v18  ;;  %v542_v52 = vmax.f32 %v512_v48, 0.0 }
 0x27e   :  { %v1137_v53 = vpop.f32.mrf.mxu0 }
 0x27f   :  { %v540_v55 = vmax.f32 %v504_v51, 0.0  ;;  %v552_v59 = vpack.c.bf16 %v542_v52, %v541_v56  ;;  %v525_v63 = vadd.f32 %v1137_v53, %v405_v18 }
 0x280   :  { %v516_v57 = vpop.f32.mrf.mxu0 }
 0x281   :  { %v551_v58 = vpack.c.bf16 %v540_v55, %v539_v54  ;;  %v517_v61 = vadd.f32 %v516_v57, %v405_v18  ;;  %v545_v7 = vmax.f32 %v525_v63, 0.0 }
 0x282   :  { %v1138_v60 = vpop.f32.mrf.mxu0 }
 0x283   :  { %v528_v62 = vadd.f32 %v1138_v60, %v405_v18  ;;  %1151 = vmatprep.mubr.msk.bf16.mxu1 %vm93_vm1, %v551_v58  ;;  %v543_v5 = vmax.f32 %v517_v61, 0.0 }
 0x284   :  { %v519_v2 = vpop.f32.mrf.mxu0  ;;  %1152 = vmatmul.mubr.msk.bf16.gmra.mxu1 %vm93_vm1, %v552_v59 }
 0x285   :  { %v520_v3 = vadd.f32 %v519_v2, %v405_v18  ;;  %v546_v4 = vmax.f32 %v528_v62, 0.0 }
 0x287   :  { %v544_v6 = vmax.f32 %v520_v3, 0.0  ;;  %v554_v9 = vpack.c.bf16 %v546_v4, %v545_v7 }
 0x289   :  { %v553_v8 = vpack.c.bf16 %v544_v6, %v543_v5 }
 0x28b   :  { %1155 = vmatprep.mubr.msk.bf16.mxu1 %vm93_vm1, %v553_v8 }
 0x28c   :  { %1156 = vmatmul.mubr.msk.bf16.gmra.mxu1 %vm93_vm1, %v554_v9 }
 0x334   :  { %v1145_v16 = vpop.f32.mrf.mxu1 }
 0x335   :  { %v690_v17 = vadd.f32 %v1145_v16, %v1387_v13 }
 0x336   :  { %v621_v18 = vpop.f32.mrf.mxu1 }
 0x337   :  { %v1025_v19 = vmul.f32 -1.442695, %v690_v17  ;;  %v688_v20 = vadd.f32 %v1387_v13, %v621_v18 }
 0x338   :  { %v1146_v15 = vpop.f32.mrf.mxu1 }
 0x339   :  { %1181 = vpow2.f32 %v1025_v19  ;;  %v1023_v22 = vmul.f32 -1.442695, %v688_v20  ;;  %v691_v23 = vadd.f32 %v1146_v15, %v1387_v13 }
 0x33a   :  { %v624_v24 = vpop.f32.mrf.mxu1 }
 0x33b   :  { %1183 = vpow2.f32 %v1023_v22  ;;  %v1026_v21 = vmul.f32 -1.442695, %v691_v23  ;;  %v689_v25 = vadd.f32 %v1387_v13, %v624_v24 }
 0x33c   :  { %v1149_v26 = vpop.f32.mrf.mxu1 }
 0x33d   :  { %1185 = vpow2.f32 %v1026_v21  ;;  %v1024_v27 = vmul.f32 -1.442695, %v689_v25  ;;  %v694_v28 = vadd.f32 %v1149_v26, %v1387_v13 }
 0x33e   :  { %v637_v29 = vpop.f32.mrf.mxu1 }
 0x33f   :  { %1187 = vpow2.f32 %v1024_v27  ;;  %v1029_v30 = vmul.f32 -1.442695, %v694_v28  ;;  %v692_v31 = vadd.f32 %v1387_v13, %v637_v29 }
 0x340   :  { %v1150_v32 = vpop.f32.mrf.mxu1 }
 0x341   :  { %1189 = vpow2.f32 %v1029_v30  ;;  %v1027_v33 = vmul.f32 -1.442695, %v692_v31  ;;  %v695_v0 = vadd.f32 %v1150_v32, %v1387_v13 }
 0x342   :  { %v640_v34 = vpop.f32.mrf.mxu1 }
 0x343   :  { %1191 = vpow2.f32 %v1027_v33  ;;  %v1030_v14 = vmul.f32 -1.442695, %v695_v0  ;;  %v693_v35 = vadd.f32 %v1387_v13, %v640_v34 }
 0x344   :  { %v1153_v1 = vpop.f32.mrf.mxu1 }
 0x345   :  { %1193 = vpow2.f32 %v1030_v14  ;;  %v1028_v36 = vmul.f32 -1.442695, %v693_v35  ;;  %v698_v37 = vadd.f32 %v1153_v1, %v1387_v13 }
 0x346   :  { %v1182_v38 = vpop.eup %1181  ;;  %v653_v39 = vpop.f32.mrf.mxu1 }
 0x347   :  { %v754_v40 = vadd.f32 1.0, %v1182_v38  ;;  %1195 = vpow2.f32 %v1028_v36  ;;  %v1033_v41 = vmul.f32 -1.442695, %v698_v37  ;;  %v696_v42 = vadd.f32 %v1387_v13, %v653_v39 }
 0x348   :  { %v1184_v43 = vpop.eup %1183  ;;  %v1154_v44 = vpop.f32.mrf.mxu1 }
 0x349   :  { %1197 = vrcp.f32 %v754_v40  ;;  %v752_v45 = vadd.f32 1.0, %v1184_v43  ;;  %v1031_v46 = vmul.f32 -1.442695, %v696_v42  ;;  %v699_v47 = vadd.f32 %v1154_v44, %v1387_v13 }
 0x34a   :  { %v1186_v48 = vpop.eup %1185  ;;  %1199 = vpow2.f32 %v1033_v41  ;;  %v656_v49 = vpop.f32.mrf.mxu1 }
 0x34b   :  { %1201 = vrcp.f32 %v752_v45  ;;  %v1034_v50 = vmul.f32 -1.442695, %v699_v47  ;;  %v697_v51 = vadd.f32 %v1387_v13, %v656_v49  ;;  %v755_v54 = vadd.f32 1.0, %v1186_v48 }
 0x34c   :  { %v1188_v52 = vpop.eup %1187  ;;  %1203 = vpow2.f32 %v1031_v46  ;;  %v1157_v53 = vpop.f32.mrf.mxu1  ;;  %v1406_v46 = vand.u32 127, %v37_v11 }
 0x34d   :  { %v753_v55 = vadd.f32 1.0, %v1188_v52  ;;  %v1032_v56 = vmul.f32 -1.442695, %v697_v51  ;;  %v702_v57 = vadd.f32 %v1157_v53, %v1387_v13  ;;  %1205 = vpow2.f32 %v1034_v50 }
 0x34e   :  { %v1190_v58 = vpop.eup %1189  ;;  %v669_v59 = vpop.f32.mrf.mxu1  ;;  %v870_v47 = vadd.s32 4294967288, %v1406_v46  ;;  %v877_v49 = vadd.s32 4294967280, %v1406_v46  ;;  %v868_v51 = vsub.s32 %v1406_v46, %v1322_v12  ;;  %v884_v53 = vadd.s32 4294967272, %v1406_v46 }
 0x34f   :  { %1207 = vrcp.f32 %v753_v55  ;;  %v758_v60 = vadd.f32 1.0, %v1190_v58  ;;  %v1037_v61 = vmul.f32 -1.442695, %v702_v57  ;;  %v700_v62 = vadd.f32 %v1387_v13, %v669_v59 }
 0x350   :  { %v1192_v63 = vpop.eup %1191  ;;  %1209 = vpow2.f32 %v1032_v56  ;;  %v1158_v2 = vpop.f32.mrf.mxu1  ;;  %v873_v50 = vsub.s32 %v870_v47, %v1322_v12  ;;  %v880_v55 = vsub.s32 %v877_v49, %v1322_v12  ;;  %v891_v11 = vadd.s32 4294967264, %v1406_v46 }
 0x351   :  { %1211 = vrcp.f32 %v755_v54  ;;  %v1035_v3 = vmul.f32 -1.442695, %v700_v62  ;;  %v703_v4 = vadd.f32 %v1158_v2, %v1387_v13  ;;  %v756_v6 = vadd.f32 1.0, %v1192_v63 }
 0x352   :  { %v1194_v5 = vpop.eup %1193  ;;  %1213 = vrcp.f32 %v758_v60  ;;  %v672_v7 = vpop.f32.mrf.mxu1  ;;  %v887_v58 = vsub.s32 %v884_v53, %v1322_v12  ;;  %v898_v60 = vadd.s32 4294967256, %v1406_v46  ;;  %v905_v2 = vadd.s32 4294967248, %v1406_v46 }
 0x353   :  { %v759_v8 = vadd.f32 1.0, %v1194_v5  ;;  %1215 = vpow2.f32 %v1037_v61  ;;  %v1038_v9 = vmul.f32 -1.442695, %v703_v4  ;;  %v701_v10 = vadd.f32 %v1387_v13, %v672_v7 }
 0x354   :  { %v1196_v16 = vpop.eup %1195  ;;  %1217 = vpow2.f32 %v1035_v3  ;;  %v894_v3 = vsub.s32 %v891_v11, %v1322_v12  ;;  %v901_v7 = vsub.s32 %v898_v60, %v1322_v12  ;;  %v968_v47 = vadd.s32 4294967176, %v1406_v46 }
 0x355   :  { %1219 = vrcp.f32 %v759_v8  ;;  %v757_v17 = vadd.f32 1.0, %v1196_v16  ;;  %v1036_v18 = vmul.f32 -1.442695, %v701_v10  ;;  %v912_v8 = vadd.s32 4294967240, %v1406_v46 }
 0x356   :  { %v1198_v19 = vpop.eup %1197  ;;  %1221 = vrcp.f32 %v756_v6  ;;  %v908_v10 = vsub.s32 %v905_v2, %v1322_v12 }
 0x357   :  { %v1200_v20 = vpop.eup %1199  ;;  %1223 = vpow2.f32 %v1038_v9  ;;  %823 = vperm.xlu1 %1169, %v1198_v19  }
 0x358   :  { %v1202_v15 = vpop.eup %1201  ;;  %v762_v22 = vadd.f32 1.0, %v1200_v20  ;;  %1225 = vpow2.f32 %v1036_v18 }
 0x359   :  { %v1204_v23 = vpop.eup %1203  ;;  %1227 = vrcp.f32 %v757_v17  ;;  %v919_v17 = vadd.s32 4294967232, %v1406_v46 }
 0x35a   :  { %v1206_v24 = vpop.eup %1205  ;;  %1229 = vrcp.f32 %v762_v22  ;;  %v760_v21 = vadd.f32 1.0, %v1204_v23  ;;  %v915_v22 = vsub.s32 %v912_v8, %v1322_v12 }
 0x35b   :  { %817 = vperm.xlu1 %1169, %v1202_v15   ;;  %v763_v25 = vadd.f32 1.0, %v1206_v24  ;;  %v926_v24 = vadd.s32 4294967224, %v1406_v46 }
 0x35c   :  { %v1208_v13 = vpop.eup %1207 }
 0x35d   :  { %v1210_v26 = vpop.eup %1209  ;;  %820 = vperm.xlu0 %1170, %v1208_v13   ;;  %1231 = vrcp.f32 %v763_v25  ;;  %v933_v25 = vadd.s32 4294967216, %v1406_v46 }
 0x35e   :  { %v1212_v27 = vpop.eup %1211  ;;  %v761_v28 = vadd.f32 1.0, %v1210_v26  ;;  %1233 = vrcp.f32 %v760_v21  ;;  %v922_v26 = vsub.s32 %v919_v17, %v1322_v12 }
 0x35f   :  { %v1214_v29 = vpop.eup %1213  ;;  %826 = vperm.xlu1 %1169, %v1212_v27   ;;  %v940_v27 = vadd.s32 4294967208, %v1406_v46 }
 0x360   :  { %v1216_v30 = vpop.eup %1215  ;;  %1235 = vrcp.f32 %v761_v28 }
 0x361   :  { %v1218_v31 = vpop.eup %1217  ;;  %835 = vperm.xlu0 %1170, %v1214_v29   ;;  %v766_v34 = vadd.f32 1.0, %v1216_v30  ;;  %v947_v30 = vadd.s32 4294967200, %v1406_v46 }
 0x362   :  { %v1220_v32 = vpop.eup %1219  ;;  %v764_v33 = vadd.f32 1.0, %v1218_v31 }
 0x363   :  { %v1222_v0 = vpop.eup %1221  ;;  %838 = vperm.xlu1 %1169, %v1220_v32  }
 0x364   :  { %v1224_v14 = vpop.eup %1223  ;;  %1237 = vrcp.f32 %v764_v33  ;;  %v929_v33 = vsub.s32 %v926_v24, %v1322_v12 }
 0x365   :  { %v1226_v35 = vpop.eup %1225  ;;  %829 = vperm.xlu0 %1170, %v1222_v0   ;;  %1239 = vrcp.f32 %v766_v34  ;;  %v767_v38 = vadd.f32 1.0, %v1224_v14  ;;  %v936_v0 = vsub.s32 %v933_v25, %v1322_v12  ;;  %v943_v14 = vsub.s32 %v940_v27, %v1322_v12 }
 0x366   :  { %v1228_v1 = vpop.eup %1227  ;;  %v765_v36 = vadd.f32 1.0, %v1226_v35 }
 0x367   :  { %832 = vperm.xlu1 %1169, %v1228_v1   ;;  %v1230_v37 = vpop.eup %1229  ;;  %v954_v1 = vadd.s32 4294967192, %v1406_v46 }
 0x368   :  { %1241 = vrcp.f32 %v765_v36 }
 0x369   :  { %847 = vperm.xlu0 %1170, %v1230_v37   ;;  %1243 = vrcp.f32 %v767_v38  ;;  %v950_v38 = vsub.s32 %v947_v30, %v1322_v12 }
 0x36a   :  { %v1232_v39 = vpop.eup %1231 }
 0x36b   :  { %v1234_v40 = vpop.eup %1233  ;;  %850 = vperm.xlu1 %1169, %v1232_v39   ;;  %v961_v39 = vadd.s32 4294967184, %v1406_v46 }
 0x36d   :  { %841 = vperm.xlu0 %1170, %v1234_v40   ;;  %v1236_v41 = vpop.eup %1235 }
 0x36f   :  { %844 = vperm.xlu1 %1169, %v1236_v41  }
 0x371   :  { %v1238_v42 = vpop.eup %1237 }
 0x372   :  { %853 = vperm.xlu0 %1170, %v1238_v42   ;;  %v1240_v43 = vpop.eup %1239 }
 0x375   :  { %v1242_v44 = vpop.eup %1241 }
 0x376   :  { %859 = vperm.xlu0 %1170, %v1240_v43   ;;  %856 = vperm.xlu1 %1169, %v1242_v44   ;;  %v1244_v45 = vpop.eup %1243 }
 0x37a   :  { %862 = vperm.xlu1 %1169, %v1244_v45   ;;  %v957_v45 = vsub.s32 %v954_v1, %v1322_v12 }
 0x3d2   :  { %v824_v48 = vpop.permute.xlu1 %823 }
 0x3d3   :  { %v881_v63 = vrot.slane %v824_v48, %v880_v55  ;;  %v971_v55 = vsub.s32 %v968_v47, %v1322_v12 }
 0x3d6   :  { %v818_v52 = vpop.permute.xlu1 %817 }
 0x3d7   :  { %v869_v57 = vrot.slane %v818_v52, %v868_v51 }
 0x3d8   :  { %v821_v54 = vpop.permute.xlu0 %820 }
 0x3d9   :  { %v874_v56 = vrot.slane %v821_v54, %v873_v50  ;;  %v964_v50 = vsub.s32 %v961_v39, %v1322_v12 }
 0x3da   :  { %v827_v59 = vpop.permute.xlu1 %826 }
 0x3db   :  { %v876_v61 = vsel %vm875_vm2, %v874_v56, %v869_v57  ;;  %v888_v4 = vrot.slane %v827_v59, %v887_v58 }
 0x3dc   :  { %v836_v62 = vpop.permute.xlu0 %835  ;;  %v883_v6 = vsel %vm882_vm3, %v881_v63, %v876_v61 }
 0x3dd   :  { %v890_v18 = vsel %vm889_vm4, %v888_v4, %v883_v6  ;;  %v909_v21 = vrot.slane %v836_v62, %v908_v10 }
 0x3de   :  { %v839_v5 = vpop.permute.xlu1 %838 }
 0x3df   :  { %v916_v31 = vrot.slane %v839_v5, %v915_v22 }
 0x3e0   :  { %v830_v9 = vpop.permute.xlu0 %829 }
 0x3e1   :  { %v895_v16 = vrot.slane %v830_v9, %v894_v3 }
 0x3e2   :  { %v833_v19 = vpop.permute.xlu1 %832 }
 0x3e3   :  { %v897_v20 = vsel %vm896_vm5, %v895_v16, %v890_v18  ;;  %v902_v15 = vrot.slane %v833_v19, %v901_v7 }
 0x3e4   :  { %v848_v23 = vpop.permute.xlu0 %847 }
 0x3e5   :  { %v904_v13 = vsel %vm903_vm6, %v902_v15, %v897_v20  ;;  %v937_v41 = vrot.slane %v848_v23, %v936_v0 }
 0x3e6   :  { %v911_v28 = vsel %vm910_vm7, %v909_v21, %v904_v13  ;;  %v851_v29 = vpop.permute.xlu1 %850 }
 0x3e7   :  { %v918_v35 = vsel %vm917_vm8, %v916_v31, %v911_v28  ;;  %v944_v43 = vrot.slane %v851_v29, %v943_v14 }
 0x3e8   :  { %v842_v32 = vpop.permute.xlu0 %841 }
 0x3e9   :  { %v923_v34 = vrot.slane %v842_v32, %v922_v26 }
 0x3ea   :  { %v845_v37 = vpop.permute.xlu1 %844 }
 0x3eb   :  { %v925_v36 = vsel %vm924_vm9, %v923_v34, %v918_v35  ;;  %v930_v40 = vrot.slane %v845_v37, %v929_v33 }
 0x3ed   :  { %v854_v42 = vpop.permute.xlu0 %853  ;;  %v932_v44 = vsel %vm931_vm10, %v930_v40, %v925_v36 }
 0x3ee   :  { %v939_v48 = vsel %vm938_vm11, %v937_v41, %v932_v44  ;;  %v951_v49 = vrot.slane %v854_v42, %v950_v38 }
 0x3ef   :  { %v946_v51 = vsel %vm945_vm12, %v944_v43, %v939_v48 }
 0x3f0   :  { %v953_v56 = vsel %vm952_vm13, %v951_v49, %v946_v51 }
 0x3f1   :  { %v860_v52 = vpop.permute.xlu0 %859  ;;  %v857_v53 = vpop.permute.xlu1 %856 }
 0x3f2   :  { %v958_v54 = vrot.slane %v857_v53, %v957_v45  ;;  %v965_v11 = vrot.slane %v860_v52, %v964_v50 }
 0x3f4   :  { %v960_v57 = vsel %vm959_vm14, %v958_v54, %v953_v56 }
 0x3f5   :  { %v863_v58 = vpop.permute.xlu1 %862  ;;  %v967_v46 = vsel %vm966_vm15, %v965_v11, %v960_v57 }
 0x3f6   :  { %v972_v59 = vrot.slane %v863_v58, %v971_v55 }
 0x3f8   :  { %v974_v60 = vsel %vm973_vm0, %v972_v59, %v967_v46 }
 0x3f9   :  { %976 = vst [vmem:[%s1446_s3] sm:$0x1] %v974_v60 }

</bundles_post_ra>
